<compile_context>
chip_gen: v7x
topology: tpu7x:2x2x1
jax: 0.10.0
libtpu: 0.0.40
codegen_flags: <defaults>
</compile_context>

<pallas_src>
import functools

import jax
import jax.numpy as jnp
from jax import lax
from jax.experimental import pallas as pl
from jax.experimental.pallas import tpu as pltpu

EPS = 1e-5
_LANE = 128  # TPU lane width: per-sample segment is padded to a multiple of it


def _resconv_kernel(x_ref, w1_ref, w2_ref, g1_ref, b1_ref, g2_ref, b2_ref,
                    o_ref, *, length, pad):
    """One sample per grid step.

    x_ref  : (Cio, seg) f32   one sample, zero-padded from L to `seg` lanes.
    w1_ref : (K, Ch, Cio) f32 conv1 taps (tap-major -> static indexing).
    w2_ref : (K, Cio, Ch) f32 conv2 taps.
    g*/b*  : (C, seg) f32     LayerNorm affine params, zero-padded to seg.
    o_ref  : (Cio, seg) f32
    """
    seg = x_ref.shape[-1]
    k = w1_ref.shape[0]

    x = x_ref[...]

    # Lane-position iota -> validity masks (cheap VPU integer ops, built once).
    lane = lax.broadcasted_iota(jnp.int32, (1, seg), 1)
    valid = lane < length                              # in-sample lanes
    # Tap t at destination j reads source j + t - pad; valid iff in [0, L).
    # This same predicate also kills the roll's wraparound lanes.
    tapmask = [((lane >= pad - t) &
                (lane < length + pad - t)).astype(jnp.float32)
               for t in range(k)]

    def conv(act, w_ref):
        # 'same' Conv1d, tap by tap: lane shift on the XLU (pltpu.roll) +
        # per-tap mask, channel mix as VPU broadcast FMAs.  With Cin=Cout=4
        # the MXU would be <2% utilized, so it is skipped entirely; for
        # channels >= ~64 switch to one fused dot of (Cout, K*Cin) weights
        # against the stacked rolled activations.
        cin = act.shape[0]
        out = None
        for t in range(k):                             # K is static
            shifted = pltpu.roll(act, shift=(pad - t) % seg, axis=1) * tapmask[t]
            wt = w_ref[t]                              # (Cout, Cin)
            for ci in range(cin):                      # Cin is static
                term = wt[:, ci:ci + 1] * shifted[ci:ci + 1, :]   # (Cout, seg)
                out = term if out is None else out + term
        return out

    def layernorm(y, g, b):
        # Per-sample LayerNorm over the (C, L) valid elements; two-pass
        # statistics (mean, then centered sum of squares), biased variance,
        # eps inside the sqrt — exactly as PyTorch.
        inv_cnt = 1.0 / (y.shape[0] * length)
        mu = jnp.sum(jnp.where(valid, y, 0.0)) * inv_cnt
        cen = jnp.where(valid, y - mu, 0.0)
        var = jnp.sum(cen * cen) * inv_cnt
        return (y - mu) * lax.rsqrt(var + EPS) * g + b

    h = jnp.maximum(layernorm(conv(x, w1_ref), g1_ref[...], b1_ref[...]), 0.0)
    z = conv(h, w2_ref)                                # (Cio, seg)
    o_ref[...] = layernorm(z + x, g2_ref[...], b2_ref[...]).astype(o_ref.dtype)


def resconv_forward(x, w1, w2, g1, b1, g2, b2):
    """Pallas forward for resconv.  x: (N, Cio, L)."""
    n, cio, length = x.shape
    ch, _, k = w1.shape
    assert k % 2 == 1, "PyTorch 'same' padding via K//2 needs odd K"
    assert ch == cio, "module only consistent for hchannels == iochannels"

    p = k // 2
    seg = ((length + _LANE - 1) // _LANE) * _LANE

    # ---- wrapper-side layout plumbing (tiny, pure XLA reshapes / pads) ----
    # activations: (N, C, L) -> lane-dense (C, N*seg), zero-padded per sample
    xf = jnp.transpose(x, (1, 0, 2)).astype(jnp.float32)
    xf = jnp.pad(xf, ((0, 0), (0, 0), (0, seg - length))).reshape(cio, n * seg)

    # conv weights: (Cout, Cin, K) -> (K, Cout, Cin)
    w1r = jnp.transpose(w1, (2, 0, 1)).astype(jnp.float32)
    w2r = jnp.transpose(w2, (2, 0, 1)).astype(jnp.float32)

    # LayerNorm params: (C, L) -> (C, seg), zero-padded (padding lanes unused).
    pad_p = lambda v: jnp.pad(v.astype(jnp.float32),
                              ((0, 0), (0, seg - length)))

    out = pl.pallas_call(
        functools.partial(_resconv_kernel, length=length, pad=p),
        out_shape=jax.ShapeDtypeStruct((cio, n * seg), jnp.float32),
        grid=(n,),
        in_specs=[
            pl.BlockSpec((cio, seg), lambda i: (0, i)),       # x, per sample
            pl.BlockSpec((k, ch, cio), lambda i: (0, 0, 0)),  # w1 (resident)
            pl.BlockSpec((k, cio, ch), lambda i: (0, 0, 0)),  # w2 (resident)
            pl.BlockSpec((ch, seg), lambda i: (0, 0)),        # g1
            pl.BlockSpec((ch, seg), lambda i: (0, 0)),        # b1
            pl.BlockSpec((cio, seg), lambda i: (0, 0)),       # g2
            pl.BlockSpec((cio, seg), lambda i: (0, 0)),       # b2
        ],
        out_specs=pl.BlockSpec((cio, seg), lambda i: (0, i)),
        compiler_params=pltpu.CompilerParams(
            dimension_semantics=("parallel",)),               # v7x: 2 TCs
    )(xf, w1r, w2r, pad_p(g1), pad_p(b1), pad_p(g2), pad_p(b2))

    # un-fold: (C, N*seg) -> (N, C, L)
    out = out.reshape(cio, n, seg)[:, :, :length]
    return jnp.transpose(out, (1, 0, 2)).astype(x.dtype)


def resconv_reference(x, w1, w2, g1, b1, g2, b2):
    """Pure-JAX reference for the PyTorch forward (broadcast multiply-adds,
    no dot), used as a precision-stable f32 oracle."""
    k = w1.shape[-1]
    p = k // 2

    def conv(inp, w):                    # inp (N,Cin,L), w (Cout,Cin,K)
        padded = jnp.pad(inp, ((0, 0), (0, 0), (p, p)))
        length = inp.shape[-1]
        out = 0.0
        for t in range(k):
            out = out + jnp.sum(
                padded[:, None, :, t:t + length] * w[None, :, :, t, None],
                axis=2)
        return out

    def ln(y, gamma, beta):
        mu = y.mean(axis=(1, 2), keepdims=True)
        var = ((y - mu) ** 2).mean(axis=(1, 2), keepdims=True)   # biased
        return (y - mu) / jnp.sqrt(var + EPS) * gamma + beta

    h = jnp.maximum(ln(conv(x, w1), g1, b1), 0.0)
    return ln(conv(h, w2) + x, g2, b2)


if __name__ == "__main__":
    # Small shapes consistent with the module: batch=2, iochannels=4,
    # hchannels=4 (default), size (L)=16, ksize=5.
    N, CIO, L, K = 2, 4, 16, 5
    CH = CIO

    key = jax.random.PRNGKey(0)
    kx, kw1, kw2, kg1, kb1, kg2, kb2 = jax.random.split(key, 7)

    x = jax.random.normal(kx, (N, CIO, L), jnp.float32)
    w1 = 0.1 * jax.random.normal(kw1, (CH, CIO, K), jnp.float32)
    w2 = 0.1 * jax.random.normal(kw2, (CIO, CH, K), jnp.float32)
    g1 = 1.0 + 0.05 * jax.random.normal(kg1, (CH, L), jnp.float32)
    b1 = 0.05 * jax.random.normal(kb1, (CH, L), jnp.float32)
    g2 = 1.0 + 0.05 * jax.random.normal(kg2, (CIO, L), jnp.float32)
    b2 = 0.05 * jax.random.normal(kb2, (CIO, L), jnp.float32)

    out = jax.block_until_ready(resconv_forward(x, w1, w2, g1, b1, g2, b2))
    ref = resconv_reference(x, w1, w2, g1, b1, g2, b2)

    assert out.shape == (N, CIO, L)
    # The kernel is pure f32 VPU math (no reduced-precision MXU passes), so a
    # tight tolerance is appropriate; any tap-shift / mask / LayerNorm
    # regression would blow past this by orders of magnitude.
    assert jnp.allclose(out, ref, rtol=1e-4, atol=1e-4), (
        float(jnp.max(jnp.abs(out - ref))))

    print("KERNEL_OK")
</pallas_src>

<mosaic_0001>
module attributes {stable_mosaic.version = 11 : i64} {
  func.func @_resconv_kernel(%arg0: i32, %arg1: memref<4x128xf32, #tpu.memory_space<vmem>>, %arg2: memref<5x4x4xf32, #tpu.memory_space<vmem>>, %arg3: memref<5x4x4xf32, #tpu.memory_space<vmem>>, %arg4: memref<4x128xf32, #tpu.memory_space<vmem>>, %arg5: memref<4x128xf32, #tpu.memory_space<vmem>>, %arg6: memref<4x128xf32, #tpu.memory_space<vmem>>, %arg7: memref<4x128xf32, #tpu.memory_space<vmem>>, %arg8: memref<4x128xf32, #tpu.memory_space<vmem>>) attributes {dimension_semantics = [#tpu.dimension_semantics<parallel>], iteration_bounds = array<i64: 2>, scalar_prefetch = 0 : i64, scratch_operands = 0 : i64, tpu.core_type = #tpu.core_type<tc>, window_params = [{transform_indices = @transform_0, window_bounds = array<i64: 4, 128>}, {pipeline_mode = #tpu.pipeline_mode<synchronous>, transform_indices = @transform_1, window_bounds = array<i64: 5, 4, 4>}, {pipeline_mode = #tpu.pipeline_mode<synchronous>, transform_indices = @transform_2, window_bounds = array<i64: 5, 4, 4>}, {pipeline_mode = #tpu.pipeline_mode<synchronous>, transform_indices = @transform_3, window_bounds = array<i64: 4, 128>}, {pipeline_mode = #tpu.pipeline_mode<synchronous>, transform_indices = @transform_4, window_bounds = array<i64: 4, 128>}, {pipeline_mode = #tpu.pipeline_mode<synchronous>, transform_indices = @transform_5, window_bounds = array<i64: 4, 128>}, {pipeline_mode = #tpu.pipeline_mode<synchronous>, transform_indices = @transform_6, window_bounds = array<i64: 4, 128>}, {transform_indices = @transform_7, window_bounds = array<i64: 4, 128>}]} {
    %c0 = arith.constant 0 : index
    %c0_0 = arith.constant 0 : index
    %0 = vector.load %arg1[%c0, %c0_0] : memref<4x128xf32, #tpu.memory_space<vmem>>, vector<4x128xf32>
    %1 = tpu.iota {dimensions = array<i32: 1>} : vector<1x128xi32>
    %c16_i32 = arith.constant 16 : i32
    %2 = vector.broadcast %c16_i32 : i32 to vector<1x128xi32>
    %3 = arith.cmpi slt, %1, %2 : vector<1x128xi32>
    %c2_i32 = arith.constant 2 : i32
    %4 = vector.broadcast %c2_i32 : i32 to vector<1x128xi32>
    %5 = arith.cmpi sge, %1, %4 : vector<1x128xi32>
    %c18_i32 = arith.constant 18 : i32
    %6 = vector.broadcast %c18_i32 : i32 to vector<1x128xi32>
    %7 = arith.cmpi slt, %1, %6 : vector<1x128xi32>
    %8 = arith.andi %5, %7 : vector<1x128xi1>
    %9 = arith.extui %8 : vector<1x128xi1> to vector<1x128xi32>
    %10 = arith.sitofp %9 : vector<1x128xi32> to vector<1x128xf32>
    %c1_i32 = arith.constant 1 : i32
    %11 = vector.broadcast %c1_i32 : i32 to vector<1x128xi32>
    %12 = arith.cmpi sge, %1, %11 : vector<1x128xi32>
    %c17_i32 = arith.constant 17 : i32
    %13 = vector.broadcast %c17_i32 : i32 to vector<1x128xi32>
    %14 = arith.cmpi slt, %1, %13 : vector<1x128xi32>
    %15 = arith.andi %12, %14 : vector<1x128xi1>
    %16 = arith.extui %15 : vector<1x128xi1> to vector<1x128xi32>
    %17 = arith.sitofp %16 : vector<1x128xi32> to vector<1x128xf32>
    %c0_i32 = arith.constant 0 : i32
    %18 = vector.broadcast %c0_i32 : i32 to vector<1x128xi32>
    %19 = arith.cmpi sge, %1, %18 : vector<1x128xi32>
    %c16_i32_1 = arith.constant 16 : i32
    %20 = vector.broadcast %c16_i32_1 : i32 to vector<1x128xi32>
    %21 = arith.cmpi slt, %1, %20 : vector<1x128xi32>
    %22 = arith.andi %19, %21 : vector<1x128xi1>
    %23 = arith.extui %22 : vector<1x128xi1> to vector<1x128xi32>
    %24 = arith.sitofp %23 : vector<1x128xi32> to vector<1x128xf32>
    %c-1_i32 = arith.constant -1 : i32
    %25 = vector.broadcast %c-1_i32 : i32 to vector<1x128xi32>
    %26 = arith.cmpi sge, %1, %25 : vector<1x128xi32>
    %c15_i32 = arith.constant 15 : i32
    %27 = vector.broadcast %c15_i32 : i32 to vector<1x128xi32>
    %28 = arith.cmpi slt, %1, %27 : vector<1x128xi32>
    %29 = arith.andi %26, %28 : vector<1x128xi1>
    %30 = arith.extui %29 : vector<1x128xi1> to vector<1x128xi32>
    %31 = arith.sitofp %30 : vector<1x128xi32> to vector<1x128xf32>
    %c-2_i32 = arith.constant -2 : i32
    %32 = vector.broadcast %c-2_i32 : i32 to vector<1x128xi32>
    %33 = arith.cmpi sge, %1, %32 : vector<1x128xi32>
    %c14_i32 = arith.constant 14 : i32
    %34 = vector.broadcast %c14_i32 : i32 to vector<1x128xi32>
    %35 = arith.cmpi slt, %1, %34 : vector<1x128xi32>
    %36 = arith.andi %33, %35 : vector<1x128xi1>
    %37 = arith.extui %36 : vector<1x128xi1> to vector<1x128xi32>
    %38 = arith.sitofp %37 : vector<1x128xi32> to vector<1x128xf32>
    %c2_i32_2 = arith.constant 2 : i32
    %39 = tpu.dynamic_rotate %0 by %c2_i32_2 dim 1 : vector<4x128xf32>, i32 -> vector<4x128xf32>
    %40 = vector.broadcast %10 : vector<1x128xf32> to vector<4x128xf32>
    %41 = arith.mulf %39, %40 : vector<4x128xf32>
    %c0_3 = arith.constant 0 : index
    %c0_4 = arith.constant 0 : index
    %c0_5 = arith.constant 0 : index
    %42 = vector.load %arg2[%c0_3, %c0_4, %c0_5] : memref<5x4x4xf32, #tpu.memory_space<vmem>>, vector<1x4x4xf32>
    %43 = vector.shape_cast %42 : vector<1x4x4xf32> to vector<4x4xf32>
    %44 = vector.extract_strided_slice %43 {offsets = [0, 0], sizes = [4, 1], strides = [1, 1]} : vector<4x4xf32> to vector<4x1xf32>
    %45 = vector.extract_strided_slice %41 {offsets = [0, 0], sizes = [1, 128], strides = [1, 1]} : vector<4x128xf32> to vector<1x128xf32>
    %46 = vector.broadcast %44 : vector<4x1xf32> to vector<4x128xf32>
    %47 = vector.broadcast %45 : vector<1x128xf32> to vector<4x128xf32>
    %48 = arith.mulf %46, %47 : vector<4x128xf32>
    %49 = vector.extract_strided_slice %43 {offsets = [0, 1], sizes = [4, 1], strides = [1, 1]} : vector<4x4xf32> to vector<4x1xf32>
    %50 = vector.extract_strided_slice %41 {offsets = [1, 0], sizes = [1, 128], strides = [1, 1]} : vector<4x128xf32> to vector<1x128xf32>
    %51 = vector.broadcast %49 : vector<4x1xf32> to vector<4x128xf32>
    %52 = vector.broadcast %50 : vector<1x128xf32> to vector<4x128xf32>
    %53 = arith.mulf %51, %52 : vector<4x128xf32>
    %54 = arith.addf %48, %53 : vector<4x128xf32>
    %55 = vector.extract_strided_slice %43 {offsets = [0, 2], sizes = [4, 1], strides = [1, 1]} : vector<4x4xf32> to vector<4x1xf32>
    %56 = vector.extract_strided_slice %41 {offsets = [2, 0], sizes = [1, 128], strides = [1, 1]} : vector<4x128xf32> to vector<1x128xf32>
    %57 = vector.broadcast %55 : vector<4x1xf32> to vector<4x128xf32>
    %58 = vector.broadcast %56 : vector<1x128xf32> to vector<4x128xf32>
    %59 = arith.mulf %57, %58 : vector<4x128xf32>
    %60 = arith.addf %54, %59 : vector<4x128xf32>
    %61 = vector.extract_strided_slice %43 {offsets = [0, 3], sizes = [4, 1], strides = [1, 1]} : vector<4x4xf32> to vector<4x1xf32>
    %62 = vector.extract_strided_slice %41 {offsets = [3, 0], sizes = [1, 128], strides = [1, 1]} : vector<4x128xf32> to vector<1x128xf32>
    %63 = vector.broadcast %61 : vector<4x1xf32> to vector<4x128xf32>
    %64 = vector.broadcast %62 : vector<1x128xf32> to vector<4x128xf32>
    %65 = arith.mulf %63, %64 : vector<4x128xf32>
    %66 = arith.addf %60, %65 : vector<4x128xf32>
    %c1_i32_6 = arith.constant 1 : i32
    %67 = tpu.dynamic_rotate %0 by %c1_i32_6 dim 1 : vector<4x128xf32>, i32 -> vector<4x128xf32>
    %68 = vector.broadcast %17 : vector<1x128xf32> to vector<4x128xf32>
    %69 = arith.mulf %67, %68 : vector<4x128xf32>
    %c1 = arith.constant 1 : index
    %c0_7 = arith.constant 0 : index
    %c0_8 = arith.constant 0 : index
    %70 = vector.load %arg2[%c1, %c0_7, %c0_8] : memref<5x4x4xf32, #tpu.memory_space<vmem>>, vector<1x4x4xf32>
    %71 = vector.shape_cast %70 : vector<1x4x4xf32> to vector<4x4xf32>
    %72 = vector.extract_strided_slice %71 {offsets = [0, 0], sizes = [4, 1], strides = [1, 1]} : vector<4x4xf32> to vector<4x1xf32>
    %73 = vector.extract_strided_slice %69 {offsets = [0, 0], sizes = [1, 128], strides = [1, 1]} : vector<4x128xf32> to vector<1x128xf32>
    %74 = vector.broadcast %72 : vector<4x1xf32> to vector<4x128xf32>
    %75 = vector.broadcast %73 : vector<1x128xf32> to vector<4x128xf32>
    %76 = arith.mulf %74, %75 : vector<4x128xf32>
    %77 = arith.addf %66, %76 : vector<4x128xf32>
    %78 = vector.extract_strided_slice %71 {offsets = [0, 1], sizes = [4, 1], strides = [1, 1]} : vector<4x4xf32> to vector<4x1xf32>
    %79 = vector.extract_strided_slice %69 {offsets = [1, 0], sizes = [1, 128], strides = [1, 1]} : vector<4x128xf32> to vector<1x128xf32>
    %80 = vector.broadcast %78 : vector<4x1xf32> to vector<4x128xf32>
    %81 = vector.broadcast %79 : vector<1x128xf32> to vector<4x128xf32>
    %82 = arith.mulf %80, %81 : vector<4x128xf32>
    %83 = arith.addf %77, %82 : vector<4x128xf32>
    %84 = vector.extract_strided_slice %71 {offsets = [0, 2], sizes = [4, 1], strides = [1, 1]} : vector<4x4xf32> to vector<4x1xf32>
    %85 = vector.extract_strided_slice %69 {offsets = [2, 0], sizes = [1, 128], strides = [1, 1]} : vector<4x128xf32> to vector<1x128xf32>
    %86 = vector.broadcast %84 : vector<4x1xf32> to vector<4x128xf32>
    %87 = vector.broadcast %85 : vector<1x128xf32> to vector<4x128xf32>
    %88 = arith.mulf %86, %87 : vector<4x128xf32>
    %89 = arith.addf %83, %88 : vector<4x128xf32>
    %90 = vector.extract_strided_slice %71 {offsets = [0, 3], sizes = [4, 1], strides = [1, 1]} : vector<4x4xf32> to vector<4x1xf32>
    %91 = vector.extract_strided_slice %69 {offsets = [3, 0], sizes = [1, 128], strides = [1, 1]} : vector<4x128xf32> to vector<1x128xf32>
    %92 = vector.broadcast %90 : vector<4x1xf32> to vector<4x128xf32>
    %93 = vector.broadcast %91 : vector<1x128xf32> to vector<4x128xf32>
    %94 = arith.mulf %92, %93 : vector<4x128xf32>
    %95 = arith.addf %89, %94 : vector<4x128xf32>
    %c0_i32_9 = arith.constant 0 : i32
    %96 = tpu.dynamic_rotate %0 by %c0_i32_9 dim 1 : vector<4x128xf32>, i32 -> vector<4x128xf32>
    %97 = vector.broadcast %24 : vector<1x128xf32> to vector<4x128xf32>
    %98 = arith.mulf %96, %97 : vector<4x128xf32>
    %c2 = arith.constant 2 : index
    %c0_10 = arith.constant 0 : index
    %c0_11 = arith.constant 0 : index
    %99 = vector.load %arg2[%c2, %c0_10, %c0_11] : memref<5x4x4xf32, #tpu.memory_space<vmem>>, vector<1x4x4xf32>
    %100 = vector.shape_cast %99 : vector<1x4x4xf32> to vector<4x4xf32>
    %101 = vector.extract_strided_slice %100 {offsets = [0, 0], sizes = [4, 1], strides = [1, 1]} : vector<4x4xf32> to vector<4x1xf32>
    %102 = vector.extract_strided_slice %98 {offsets = [0, 0], sizes = [1, 128], strides = [1, 1]} : vector<4x128xf32> to vector<1x128xf32>
    %103 = vector.broadcast %101 : vector<4x1xf32> to vector<4x128xf32>
    %104 = vector.broadcast %102 : vector<1x128xf32> to vector<4x128xf32>
    %105 = arith.mulf %103, %104 : vector<4x128xf32>
    %106 = arith.addf %95, %105 : vector<4x128xf32>
    %107 = vector.extract_strided_slice %100 {offsets = [0, 1], sizes = [4, 1], strides = [1, 1]} : vector<4x4xf32> to vector<4x1xf32>
    %108 = vector.extract_strided_slice %98 {offsets = [1, 0], sizes = [1, 128], strides = [1, 1]} : vector<4x128xf32> to vector<1x128xf32>
    %109 = vector.broadcast %107 : vector<4x1xf32> to vector<4x128xf32>
    %110 = vector.broadcast %108 : vector<1x128xf32> to vector<4x128xf32>
    %111 = arith.mulf %109, %110 : vector<4x128xf32>
    %112 = arith.addf %106, %111 : vector<4x128xf32>
    %113 = vector.extract_strided_slice %100 {offsets = [0, 2], sizes = [4, 1], strides = [1, 1]} : vector<4x4xf32> to vector<4x1xf32>
    %114 = vector.extract_strided_slice %98 {offsets = [2, 0], sizes = [1, 128], strides = [1, 1]} : vector<4x128xf32> to vector<1x128xf32>
    %115 = vector.broadcast %113 : vector<4x1xf32> to vector<4x128xf32>
    %116 = vector.broadcast %114 : vector<1x128xf32> to vector<4x128xf32>
    %117 = arith.mulf %115, %116 : vector<4x128xf32>
    %118 = arith.addf %112, %117 : vector<4x128xf32>
    %119 = vector.extract_strided_slice %100 {offsets = [0, 3], sizes = [4, 1], strides = [1, 1]} : vector<4x4xf32> to vector<4x1xf32>
    %120 = vector.extract_strided_slice %98 {offsets = [3, 0], sizes = [1, 128], strides = [1, 1]} : vector<4x128xf32> to vector<1x128xf32>
    %121 = vector.broadcast %119 : vector<4x1xf32> to vector<4x128xf32>
    %122 = vector.broadcast %120 : vector<1x128xf32> to vector<4x128xf32>
    %123 = arith.mulf %121, %122 : vector<4x128xf32>
    %124 = arith.addf %118, %123 : vector<4x128xf32>
    %c127_i32 = arith.constant 127 : i32
    %125 = tpu.dynamic_rotate %0 by %c127_i32 dim 1 : vector<4x128xf32>, i32 -> vector<4x128xf32>
    %126 = vector.broadcast %31 : vector<1x128xf32> to vector<4x128xf32>
    %127 = arith.mulf %125, %126 : vector<4x128xf32>
    %c3 = arith.constant 3 : index
    %c0_12 = arith.constant 0 : index
    %c0_13 = arith.constant 0 : index
    %128 = vector.load %arg2[%c3, %c0_12, %c0_13] : memref<5x4x4xf32, #tpu.memory_space<vmem>>, vector<1x4x4xf32>
    %129 = vector.shape_cast %128 : vector<1x4x4xf32> to vector<4x4xf32>
    %130 = vector.extract_strided_slice %129 {offsets = [0, 0], sizes = [4, 1], strides = [1, 1]} : vector<4x4xf32> to vector<4x1xf32>
    %131 = vector.extract_strided_slice %127 {offsets = [0, 0], sizes = [1, 128], strides = [1, 1]} : vector<4x128xf32> to vector<1x128xf32>
    %132 = vector.broadcast %130 : vector<4x1xf32> to vector<4x128xf32>
    %133 = vector.broadcast %131 : vector<1x128xf32> to vector<4x128xf32>
    %134 = arith.mulf %132, %133 : vector<4x128xf32>
    %135 = arith.addf %124, %134 : vector<4x128xf32>
    %136 = vector.extract_strided_slice %129 {offsets = [0, 1], sizes = [4, 1], strides = [1, 1]} : vector<4x4xf32> to vector<4x1xf32>
    %137 = vector.extract_strided_slice %127 {offsets = [1, 0], sizes = [1, 128], strides = [1, 1]} : vector<4x128xf32> to vector<1x128xf32>
    %138 = vector.broadcast %136 : vector<4x1xf32> to vector<4x128xf32>
    %139 = vector.broadcast %137 : vector<1x128xf32> to vector<4x128xf32>
    %140 = arith.mulf %138, %139 : vector<4x128xf32>
    %141 = arith.addf %135, %140 : vector<4x128xf32>
    %142 = vector.extract_strided_slice %129 {offsets = [0, 2], sizes = [4, 1], strides = [1, 1]} : vector<4x4xf32> to vector<4x1xf32>
    %143 = vector.extract_strided_slice %127 {offsets = [2, 0], sizes = [1, 128], strides = [1, 1]} : vector<4x128xf32> to vector<1x128xf32>
    %144 = vector.broadcast %142 : vector<4x1xf32> to vector<4x128xf32>
    %145 = vector.broadcast %143 : vector<1x128xf32> to vector<4x128xf32>
    %146 = arith.mulf %144, %145 : vector<4x128xf32>
    %147 = arith.addf %141, %146 : vector<4x128xf32>
    %148 = vector.extract_strided_slice %129 {offsets = [0, 3], sizes = [4, 1], strides = [1, 1]} : vector<4x4xf32> to vector<4x1xf32>
    %149 = vector.extract_strided_slice %127 {offsets = [3, 0], sizes = [1, 128], strides = [1, 1]} : vector<4x128xf32> to vector<1x128xf32>
    %150 = vector.broadcast %148 : vector<4x1xf32> to vector<4x128xf32>
    %151 = vector.broadcast %149 : vector<1x128xf32> to vector<4x128xf32>
    %152 = arith.mulf %150, %151 : vector<4x128xf32>
    %153 = arith.addf %147, %152 : vector<4x128xf32>
    %c126_i32 = arith.constant 126 : i32
    %154 = tpu.dynamic_rotate %0 by %c126_i32 dim 1 : vector<4x128xf32>, i32 -> vector<4x128xf32>
    %155 = vector.broadcast %38 : vector<1x128xf32> to vector<4x128xf32>
    %156 = arith.mulf %154, %155 : vector<4x128xf32>
    %c4 = arith.constant 4 : index
    %c0_14 = arith.constant 0 : index
    %c0_15 = arith.constant 0 : index
    %157 = vector.load %arg2[%c4, %c0_14, %c0_15] : memref<5x4x4xf32, #tpu.memory_space<vmem>>, vector<1x4x4xf32>
    %158 = vector.shape_cast %157 : vector<1x4x4xf32> to vector<4x4xf32>
    %159 = vector.extract_strided_slice %158 {offsets = [0, 0], sizes = [4, 1], strides = [1, 1]} : vector<4x4xf32> to vector<4x1xf32>
    %160 = vector.extract_strided_slice %156 {offsets = [0, 0], sizes = [1, 128], strides = [1, 1]} : vector<4x128xf32> to vector<1x128xf32>
    %161 = vector.broadcast %159 : vector<4x1xf32> to vector<4x128xf32>
    %162 = vector.broadcast %160 : vector<1x128xf32> to vector<4x128xf32>
    %163 = arith.mulf %161, %162 : vector<4x128xf32>
    %164 = arith.addf %153, %163 : vector<4x128xf32>
    %165 = vector.extract_strided_slice %158 {offsets = [0, 1], sizes = [4, 1], strides = [1, 1]} : vector<4x4xf32> to vector<4x1xf32>
    %166 = vector.extract_strided_slice %156 {offsets = [1, 0], sizes = [1, 128], strides = [1, 1]} : vector<4x128xf32> to vector<1x128xf32>
    %167 = vector.broadcast %165 : vector<4x1xf32> to vector<4x128xf32>
    %168 = vector.broadcast %166 : vector<1x128xf32> to vector<4x128xf32>
    %169 = arith.mulf %167, %168 : vector<4x128xf32>
    %170 = arith.addf %164, %169 : vector<4x128xf32>
    %171 = vector.extract_strided_slice %158 {offsets = [0, 2], sizes = [4, 1], strides = [1, 1]} : vector<4x4xf32> to vector<4x1xf32>
    %172 = vector.extract_strided_slice %156 {offsets = [2, 0], sizes = [1, 128], strides = [1, 1]} : vector<4x128xf32> to vector<1x128xf32>
    %173 = vector.broadcast %171 : vector<4x1xf32> to vector<4x128xf32>
    %174 = vector.broadcast %172 : vector<1x128xf32> to vector<4x128xf32>
    %175 = arith.mulf %173, %174 : vector<4x128xf32>
    %176 = arith.addf %170, %175 : vector<4x128xf32>
    %177 = vector.extract_strided_slice %158 {offsets = [0, 3], sizes = [4, 1], strides = [1, 1]} : vector<4x4xf32> to vector<4x1xf32>
    %178 = vector.extract_strided_slice %156 {offsets = [3, 0], sizes = [1, 128], strides = [1, 1]} : vector<4x128xf32> to vector<1x128xf32>
    %179 = vector.broadcast %177 : vector<4x1xf32> to vector<4x128xf32>
    %180 = vector.broadcast %178 : vector<1x128xf32> to vector<4x128xf32>
    %181 = arith.mulf %179, %180 : vector<4x128xf32>
    %182 = arith.addf %176, %181 : vector<4x128xf32>
    %c0_16 = arith.constant 0 : index
    %c0_17 = arith.constant 0 : index
    %183 = vector.load %arg4[%c0_16, %c0_17] : memref<4x128xf32, #tpu.memory_space<vmem>>, vector<4x128xf32>
    %c0_18 = arith.constant 0 : index
    %c0_19 = arith.constant 0 : index
    %184 = vector.load %arg5[%c0_18, %c0_19] : memref<4x128xf32, #tpu.memory_space<vmem>>, vector<4x128xf32>
    %cst = arith.constant 0.000000e+00 : f32
    %185 = vector.shape_cast %3 : vector<1x128xi1> to vector<1x128xi1>
    %186 = vector.broadcast %185 : vector<1x128xi1> to vector<4x128xi1>
    %187 = vector.broadcast %cst : f32 to vector<4x128xf32>
    %188 = arith.select %186, %182, %187 : vector<4x128xi1>, vector<4x128xf32>
    %189 = vector.shape_cast %188 : vector<4x128xf32> to vector<1x4x128xf32>
    %cst_20 = arith.constant dense<0.000000e+00> : vector<1xf32>
    %190 = vector.multi_reduction <add>, %189, %cst_20 [1, 2] : vector<1x4x128xf32> to vector<1xf32>
    %191 = vector.shape_cast %190 : vector<1xf32> to vector<1x1x1xf32>
    %192 = vector.extract %191[0, 0, 0] : f32 from vector<1x1x1xf32>
    %cst_21 = arith.constant 1.562500e-02 : f32
    %193 = arith.mulf %192, %cst_21 : f32
    %194 = vector.broadcast %193 : f32 to vector<4x128xf32>
    %195 = arith.subf %182, %194 : vector<4x128xf32>
    %cst_22 = arith.constant 0.000000e+00 : f32
    %196 = vector.shape_cast %3 : vector<1x128xi1> to vector<1x128xi1>
    %197 = vector.broadcast %196 : vector<1x128xi1> to vector<4x128xi1>
    %198 = vector.broadcast %cst_22 : f32 to vector<4x128xf32>
    %199 = arith.select %197, %195, %198 : vector<4x128xi1>, vector<4x128xf32>
    %200 = arith.mulf %199, %199 : vector<4x128xf32>
    %201 = vector.shape_cast %200 : vector<4x128xf32> to vector<1x4x128xf32>
    %cst_23 = arith.constant dense<0.000000e+00> : vector<1xf32>
    %202 = vector.multi_reduction <add>, %201, %cst_23 [1, 2] : vector<1x4x128xf32> to vector<1xf32>
    %203 = vector.shape_cast %202 : vector<1xf32> to vector<1x1x1xf32>
    %204 = vector.extract %203[0, 0, 0] : f32 from vector<1x1x1xf32>
    %cst_24 = arith.constant 1.562500e-02 : f32
    %205 = arith.mulf %204, %cst_24 : f32
    %206 = vector.broadcast %193 : f32 to vector<4x128xf32>
    %207 = arith.subf %182, %206 : vector<4x128xf32>
    %cst_25 = arith.constant 9.99999974E-6 : f32
    %208 = arith.addf %205, %cst_25 : f32
    %209 = math.rsqrt %208 : f32
    %210 = vector.broadcast %209 : f32 to vector<4x128xf32>
    %211 = arith.mulf %207, %210 : vector<4x128xf32>
    %212 = arith.mulf %211, %183 : vector<4x128xf32>
    %213 = arith.addf %212, %184 : vector<4x128xf32>
    %cst_26 = arith.constant 0.000000e+00 : f32
    %214 = vector.broadcast %cst_26 : f32 to vector<4x128xf32>
    %215 = arith.maximumf %213, %214 : vector<4x128xf32>
    %c2_i32_27 = arith.constant 2 : i32
    %216 = tpu.dynamic_rotate %215 by %c2_i32_27 dim 1 : vector<4x128xf32>, i32 -> vector<4x128xf32>
    %217 = vector.broadcast %10 : vector<1x128xf32> to vector<4x128xf32>
    %218 = arith.mulf %216, %217 : vector<4x128xf32>
    %c0_28 = arith.constant 0 : index
    %c0_29 = arith.constant 0 : index
    %c0_30 = arith.constant 0 : index
    %219 = vector.load %arg3[%c0_28, %c0_29, %c0_30] : memref<5x4x4xf32, #tpu.memory_space<vmem>>, vector<1x4x4xf32>
    %220 = vector.shape_cast %219 : vector<1x4x4xf32> to vector<4x4xf32>
    %221 = vector.extract_strided_slice %220 {offsets = [0, 0], sizes = [4, 1], strides = [1, 1]} : vector<4x4xf32> to vector<4x1xf32>
    %222 = vector.extract_strided_slice %218 {offsets = [0, 0], sizes = [1, 128], strides = [1, 1]} : vector<4x128xf32> to vector<1x128xf32>
    %223 = vector.broadcast %221 : vector<4x1xf32> to vector<4x128xf32>
    %224 = vector.broadcast %222 : vector<1x128xf32> to vector<4x128xf32>
    %225 = arith.mulf %223, %224 : vector<4x128xf32>
    %226 = vector.extract_strided_slice %220 {offsets = [0, 1], sizes = [4, 1], strides = [1, 1]} : vector<4x4xf32> to vector<4x1xf32>
    %227 = vector.extract_strided_slice %218 {offsets = [1, 0], sizes = [1, 128], strides = [1, 1]} : vector<4x128xf32> to vector<1x128xf32>
    %228 = vector.broadcast %226 : vector<4x1xf32> to vector<4x128xf32>
    %229 = vector.broadcast %227 : vector<1x128xf32> to vector<4x128xf32>
    %230 = arith.mulf %228, %229 : vector<4x128xf32>
    %231 = arith.addf %225, %230 : vector<4x128xf32>
    %232 = vector.extract_strided_slice %220 {offsets = [0, 2], sizes = [4, 1], strides = [1, 1]} : vector<4x4xf32> to vector<4x1xf32>
    %233 = vector.extract_strided_slice %218 {offsets = [2, 0], sizes = [1, 128], strides = [1, 1]} : vector<4x128xf32> to vector<1x128xf32>
    %234 = vector.broadcast %232 : vector<4x1xf32> to vector<4x128xf32>
    %235 = vector.broadcast %233 : vector<1x128xf32> to vector<4x128xf32>
    %236 = arith.mulf %234, %235 : vector<4x128xf32>
    %237 = arith.addf %231, %236 : vector<4x128xf32>
    %238 = vector.extract_strided_slice %220 {offsets = [0, 3], sizes = [4, 1], strides = [1, 1]} : vector<4x4xf32> to vector<4x1xf32>
    %239 = vector.extract_strided_slice %218 {offsets = [3, 0], sizes = [1, 128], strides = [1, 1]} : vector<4x128xf32> to vector<1x128xf32>
    %240 = vector.broadcast %238 : vector<4x1xf32> to vector<4x128xf32>
    %241 = vector.broadcast %239 : vector<1x128xf32> to vector<4x128xf32>
    %242 = arith.mulf %240, %241 : vector<4x128xf32>
    %243 = arith.addf %237, %242 : vector<4x128xf32>
    %c1_i32_31 = arith.constant 1 : i32
    %244 = tpu.dynamic_rotate %215 by %c1_i32_31 dim 1 : vector<4x128xf32>, i32 -> vector<4x128xf32>
    %245 = vector.broadcast %17 : vector<1x128xf32> to vector<4x128xf32>
    %246 = arith.mulf %244, %245 : vector<4x128xf32>
    %c1_32 = arith.constant 1 : index
    %c0_33 = arith.constant 0 : index
    %c0_34 = arith.constant 0 : index
    %247 = vector.load %arg3[%c1_32, %c0_33, %c0_34] : memref<5x4x4xf32, #tpu.memory_space<vmem>>, vector<1x4x4xf32>
    %248 = vector.shape_cast %247 : vector<1x4x4xf32> to vector<4x4xf32>
    %249 = vector.extract_strided_slice %248 {offsets = [0, 0], sizes = [4, 1], strides = [1, 1]} : vector<4x4xf32> to vector<4x1xf32>
    %250 = vector.extract_strided_slice %246 {offsets = [0, 0], sizes = [1, 128], strides = [1, 1]} : vector<4x128xf32> to vector<1x128xf32>
    %251 = vector.broadcast %249 : vector<4x1xf32> to vector<4x128xf32>
    %252 = vector.broadcast %250 : vector<1x128xf32> to vector<4x128xf32>
    %253 = arith.mulf %251, %252 : vector<4x128xf32>
    %254 = arith.addf %243, %253 : vector<4x128xf32>
    %255 = vector.extract_strided_slice %248 {offsets = [0, 1], sizes = [4, 1], strides = [1, 1]} : vector<4x4xf32> to vector<4x1xf32>
    %256 = vector.extract_strided_slice %246 {offsets = [1, 0], sizes = [1, 128], strides = [1, 1]} : vector<4x128xf32> to vector<1x128xf32>
    %257 = vector.broadcast %255 : vector<4x1xf32> to vector<4x128xf32>
    %258 = vector.broadcast %256 : vector<1x128xf32> to vector<4x128xf32>
    %259 = arith.mulf %257, %258 : vector<4x128xf32>
    %260 = arith.addf %254, %259 : vector<4x128xf32>
    %261 = vector.extract_strided_slice %248 {offsets = [0, 2], sizes = [4, 1], strides = [1, 1]} : vector<4x4xf32> to vector<4x1xf32>
    %262 = vector.extract_strided_slice %246 {offsets = [2, 0], sizes = [1, 128], strides = [1, 1]} : vector<4x128xf32> to vector<1x128xf32>
    %263 = vector.broadcast %261 : vector<4x1xf32> to vector<4x128xf32>
    %264 = vector.broadcast %262 : vector<1x128xf32> to vector<4x128xf32>
    %265 = arith.mulf %263, %264 : vector<4x128xf32>
    %266 = arith.addf %260, %265 : vector<4x128xf32>
    %267 = vector.extract_strided_slice %248 {offsets = [0, 3], sizes = [4, 1], strides = [1, 1]} : vector<4x4xf32> to vector<4x1xf32>
    %268 = vector.extract_strided_slice %246 {offsets = [3, 0], sizes = [1, 128], strides = [1, 1]} : vector<4x128xf32> to vector<1x128xf32>
    %269 = vector.broadcast %267 : vector<4x1xf32> to vector<4x128xf32>
    %270 = vector.broadcast %268 : vector<1x128xf32> to vector<4x128xf32>
    %271 = arith.mulf %269, %270 : vector<4x128xf32>
    %272 = arith.addf %266, %271 : vector<4x128xf32>
    %c0_i32_35 = arith.constant 0 : i32
    %273 = tpu.dynamic_rotate %215 by %c0_i32_35 dim 1 : vector<4x128xf32>, i32 -> vector<4x128xf32>
    %274 = vector.broadcast %24 : vector<1x128xf32> to vector<4x128xf32>
    %275 = arith.mulf %273, %274 : vector<4x128xf32>
    %c2_36 = arith.constant 2 : index
    %c0_37 = arith.constant 0 : index
    %c0_38 = arith.constant 0 : index
    %276 = vector.load %arg3[%c2_36, %c0_37, %c0_38] : memref<5x4x4xf32, #tpu.memory_space<vmem>>, vector<1x4x4xf32>
    %277 = vector.shape_cast %276 : vector<1x4x4xf32> to vector<4x4xf32>
    %278 = vector.extract_strided_slice %277 {offsets = [0, 0], sizes = [4, 1], strides = [1, 1]} : vector<4x4xf32> to vector<4x1xf32>
    %279 = vector.extract_strided_slice %275 {offsets = [0, 0], sizes = [1, 128], strides = [1, 1]} : vector<4x128xf32> to vector<1x128xf32>
    %280 = vector.broadcast %278 : vector<4x1xf32> to vector<4x128xf32>
    %281 = vector.broadcast %279 : vector<1x128xf32> to vector<4x128xf32>
    %282 = arith.mulf %280, %281 : vector<4x128xf32>
    %283 = arith.addf %272, %282 : vector<4x128xf32>
    %284 = vector.extract_strided_slice %277 {offsets = [0, 1], sizes = [4, 1], strides = [1, 1]} : vector<4x4xf32> to vector<4x1xf32>
    %285 = vector.extract_strided_slice %275 {offsets = [1, 0], sizes = [1, 128], strides = [1, 1]} : vector<4x128xf32> to vector<1x128xf32>
    %286 = vector.broadcast %284 : vector<4x1xf32> to vector<4x128xf32>
    %287 = vector.broadcast %285 : vector<1x128xf32> to vector<4x128xf32>
    %288 = arith.mulf %286, %287 : vector<4x128xf32>
    %289 = arith.addf %283, %288 : vector<4x128xf32>
    %290 = vector.extract_strided_slice %277 {offsets = [0, 2], sizes = [4, 1], strides = [1, 1]} : vector<4x4xf32> to vector<4x1xf32>
    %291 = vector.extract_strided_slice %275 {offsets = [2, 0], sizes = [1, 128], strides = [1, 1]} : vector<4x128xf32> to vector<1x128xf32>
    %292 = vector.broadcast %290 : vector<4x1xf32> to vector<4x128xf32>
    %293 = vector.broadcast %291 : vector<1x128xf32> to vector<4x128xf32>
    %294 = arith.mulf %292, %293 : vector<4x128xf32>
    %295 = arith.addf %289, %294 : vector<4x128xf32>
    %296 = vector.extract_strided_slice %277 {offsets = [0, 3], sizes = [4, 1], strides = [1, 1]} : vector<4x4xf32> to vector<4x1xf32>
    %297 = vector.extract_strided_slice %275 {offsets = [3, 0], sizes = [1, 128], strides = [1, 1]} : vector<4x128xf32> to vector<1x128xf32>
    %298 = vector.broadcast %296 : vector<4x1xf32> to vector<4x128xf32>
    %299 = vector.broadcast %297 : vector<1x128xf32> to vector<4x128xf32>
    %300 = arith.mulf %298, %299 : vector<4x128xf32>
    %301 = arith.addf %295, %300 : vector<4x128xf32>
    %c127_i32_39 = arith.constant 127 : i32
    %302 = tpu.dynamic_rotate %215 by %c127_i32_39 dim 1 : vector<4x128xf32>, i32 -> vector<4x128xf32>
    %303 = vector.broadcast %31 : vector<1x128xf32> to vector<4x128xf32>
    %304 = arith.mulf %302, %303 : vector<4x128xf32>
    %c3_40 = arith.constant 3 : index
    %c0_41 = arith.constant 0 : index
    %c0_42 = arith.constant 0 : index
    %305 = vector.load %arg3[%c3_40, %c0_41, %c0_42] : memref<5x4x4xf32, #tpu.memory_space<vmem>>, vector<1x4x4xf32>
    %306 = vector.shape_cast %305 : vector<1x4x4xf32> to vector<4x4xf32>
    %307 = vector.extract_strided_slice %306 {offsets = [0, 0], sizes = [4, 1], strides = [1, 1]} : vector<4x4xf32> to vector<4x1xf32>
    %308 = vector.extract_strided_slice %304 {offsets = [0, 0], sizes = [1, 128], strides = [1, 1]} : vector<4x128xf32> to vector<1x128xf32>
    %309 = vector.broadcast %307 : vector<4x1xf32> to vector<4x128xf32>
    %310 = vector.broadcast %308 : vector<1x128xf32> to vector<4x128xf32>
    %311 = arith.mulf %309, %310 : vector<4x128xf32>
    %312 = arith.addf %301, %311 : vector<4x128xf32>
    %313 = vector.extract_strided_slice %306 {offsets = [0, 1], sizes = [4, 1], strides = [1, 1]} : vector<4x4xf32> to vector<4x1xf32>
    %314 = vector.extract_strided_slice %304 {offsets = [1, 0], sizes = [1, 128], strides = [1, 1]} : vector<4x128xf32> to vector<1x128xf32>
    %315 = vector.broadcast %313 : vector<4x1xf32> to vector<4x128xf32>
    %316 = vector.broadcast %314 : vector<1x128xf32> to vector<4x128xf32>
    %317 = arith.mulf %315, %316 : vector<4x128xf32>
    %318 = arith.addf %312, %317 : vector<4x128xf32>
    %319 = vector.extract_strided_slice %306 {offsets = [0, 2], sizes = [4, 1], strides = [1, 1]} : vector<4x4xf32> to vector<4x1xf32>
    %320 = vector.extract_strided_slice %304 {offsets = [2, 0], sizes = [1, 128], strides = [1, 1]} : vector<4x128xf32> to vector<1x128xf32>
    %321 = vector.broadcast %319 : vector<4x1xf32> to vector<4x128xf32>
    %322 = vector.broadcast %320 : vector<1x128xf32> to vector<4x128xf32>
    %323 = arith.mulf %321, %322 : vector<4x128xf32>
    %324 = arith.addf %318, %323 : vector<4x128xf32>
    %325 = vector.extract_strided_slice %306 {offsets = [0, 3], sizes = [4, 1], strides = [1, 1]} : vector<4x4xf32> to vector<4x1xf32>
    %326 = vector.extract_strided_slice %304 {offsets = [3, 0], sizes = [1, 128], strides = [1, 1]} : vector<4x128xf32> to vector<1x128xf32>
    %327 = vector.broadcast %325 : vector<4x1xf32> to vector<4x128xf32>
    %328 = vector.broadcast %326 : vector<1x128xf32> to vector<4x128xf32>
    %329 = arith.mulf %327, %328 : vector<4x128xf32>
    %330 = arith.addf %324, %329 : vector<4x128xf32>
    %c126_i32_43 = arith.constant 126 : i32
    %331 = tpu.dynamic_rotate %215 by %c126_i32_43 dim 1 : vector<4x128xf32>, i32 -> vector<4x128xf32>
    %332 = vector.broadcast %38 : vector<1x128xf32> to vector<4x128xf32>
    %333 = arith.mulf %331, %332 : vector<4x128xf32>
    %c4_44 = arith.constant 4 : index
    %c0_45 = arith.constant 0 : index
    %c0_46 = arith.constant 0 : index
    %334 = vector.load %arg3[%c4_44, %c0_45, %c0_46] : memref<5x4x4xf32, #tpu.memory_space<vmem>>, vector<1x4x4xf32>
    %335 = vector.shape_cast %334 : vector<1x4x4xf32> to vector<4x4xf32>
    %336 = vector.extract_strided_slice %335 {offsets = [0, 0], sizes = [4, 1], strides = [1, 1]} : vector<4x4xf32> to vector<4x1xf32>
    %337 = vector.extract_strided_slice %333 {offsets = [0, 0], sizes = [1, 128], strides = [1, 1]} : vector<4x128xf32> to vector<1x128xf32>
    %338 = vector.broadcast %336 : vector<4x1xf32> to vector<4x128xf32>
    %339 = vector.broadcast %337 : vector<1x128xf32> to vector<4x128xf32>
    %340 = arith.mulf %338, %339 : vector<4x128xf32>
    %341 = arith.addf %330, %340 : vector<4x128xf32>
    %342 = vector.extract_strided_slice %335 {offsets = [0, 1], sizes = [4, 1], strides = [1, 1]} : vector<4x4xf32> to vector<4x1xf32>
    %343 = vector.extract_strided_slice %333 {offsets = [1, 0], sizes = [1, 128], strides = [1, 1]} : vector<4x128xf32> to vector<1x128xf32>
    %344 = vector.broadcast %342 : vector<4x1xf32> to vector<4x128xf32>
    %345 = vector.broadcast %343 : vector<1x128xf32> to vector<4x128xf32>
    %346 = arith.mulf %344, %345 : vector<4x128xf32>
    %347 = arith.addf %341, %346 : vector<4x128xf32>
    %348 = vector.extract_strided_slice %335 {offsets = [0, 2], sizes = [4, 1], strides = [1, 1]} : vector<4x4xf32> to vector<4x1xf32>
    %349 = vector.extract_strided_slice %333 {offsets = [2, 0], sizes = [1, 128], strides = [1, 1]} : vector<4x128xf32> to vector<1x128xf32>
    %350 = vector.broadcast %348 : vector<4x1xf32> to vector<4x128xf32>
    %351 = vector.broadcast %349 : vector<1x128xf32> to vector<4x128xf32>
    %352 = arith.mulf %350, %351 : vector<4x128xf32>
    %353 = arith.addf %347, %352 : vector<4x128xf32>
    %354 = vector.extract_strided_slice %335 {offsets = [0, 3], sizes = [4, 1], strides = [1, 1]} : vector<4x4xf32> to vector<4x1xf32>
    %355 = vector.extract_strided_slice %333 {offsets = [3, 0], sizes = [1, 128], strides = [1, 1]} : vector<4x128xf32> to vector<1x128xf32>
    %356 = vector.broadcast %354 : vector<4x1xf32> to vector<4x128xf32>
    %357 = vector.broadcast %355 : vector<1x128xf32> to vector<4x128xf32>
    %358 = arith.mulf %356, %357 : vector<4x128xf32>
    %359 = arith.addf %353, %358 : vector<4x128xf32>
    %360 = arith.addf %359, %0 : vector<4x128xf32>
    %c0_47 = arith.constant 0 : index
    %c0_48 = arith.constant 0 : index
    %361 = vector.load %arg6[%c0_47, %c0_48] : memref<4x128xf32, #tpu.memory_space<vmem>>, vector<4x128xf32>
    %c0_49 = arith.constant 0 : index
    %c0_50 = arith.constant 0 : index
    %362 = vector.load %arg7[%c0_49, %c0_50] : memref<4x128xf32, #tpu.memory_space<vmem>>, vector<4x128xf32>
    %cst_51 = arith.constant 0.000000e+00 : f32
    %363 = vector.shape_cast %3 : vector<1x128xi1> to vector<1x128xi1>
    %364 = vector.broadcast %363 : vector<1x128xi1> to vector<4x128xi1>
    %365 = vector.broadcast %cst_51 : f32 to vector<4x128xf32>
    %366 = arith.select %364, %360, %365 : vector<4x128xi1>, vector<4x128xf32>
    %367 = vector.shape_cast %366 : vector<4x128xf32> to vector<1x4x128xf32>
    %cst_52 = arith.constant dense<0.000000e+00> : vector<1xf32>
    %368 = vector.multi_reduction <add>, %367, %cst_52 [1, 2] : vector<1x4x128xf32> to vector<1xf32>
    %369 = vector.shape_cast %368 : vector<1xf32> to vector<1x1x1xf32>
    %370 = vector.extract %369[0, 0, 0] : f32 from vector<1x1x1xf32>
    %cst_53 = arith.constant 1.562500e-02 : f32
    %371 = arith.mulf %370, %cst_53 : f32
    %372 = vector.broadcast %371 : f32 to vector<4x128xf32>
    %373 = arith.subf %360, %372 : vector<4x128xf32>
    %cst_54 = arith.constant 0.000000e+00 : f32
    %374 = vector.shape_cast %3 : vector<1x128xi1> to vector<1x128xi1>
    %375 = vector.broadcast %374 : vector<1x128xi1> to vector<4x128xi1>
    %376 = vector.broadcast %cst_54 : f32 to vector<4x128xf32>
    %377 = arith.select %375, %373, %376 : vector<4x128xi1>, vector<4x128xf32>
    %378 = arith.mulf %377, %377 : vector<4x128xf32>
    %379 = vector.shape_cast %378 : vector<4x128xf32> to vector<1x4x128xf32>
    %cst_55 = arith.constant dense<0.000000e+00> : vector<1xf32>
    %380 = vector.multi_reduction <add>, %379, %cst_55 [1, 2] : vector<1x4x128xf32> to vector<1xf32>
    %381 = vector.shape_cast %380 : vector<1xf32> to vector<1x1x1xf32>
    %382 = vector.extract %381[0, 0, 0] : f32 from vector<1x1x1xf32>
    %cst_56 = arith.constant 1.562500e-02 : f32
    %383 = arith.mulf %382, %cst_56 : f32
    %384 = vector.broadcast %371 : f32 to vector<4x128xf32>
    %385 = arith.subf %360, %384 : vector<4x128xf32>
    %cst_57 = arith.constant 9.99999974E-6 : f32
    %386 = arith.addf %383, %cst_57 : f32
    %387 = math.rsqrt %386 : f32
    %388 = vector.broadcast %387 : f32 to vector<4x128xf32>
    %389 = arith.mulf %385, %388 : vector<4x128xf32>
    %390 = arith.mulf %389, %361 : vector<4x128xf32>
    %391 = arith.addf %390, %362 : vector<4x128xf32>
    %c0_58 = arith.constant 0 : index
    %c0_59 = arith.constant 0 : index
    %392 = vector.load %arg8[%c0_58, %c0_59] : memref<4x128xf32, #tpu.memory_space<vmem>>, vector<4x128xf32>
    tpu.vector_store %arg8[%c0_58, %c0_59], %391 {strides = array<i32>} : memref<4x128xf32, #tpu.memory_space<vmem>>, vector<4x128xf32>,
    return
  }
  func.func @transform_0(%arg0: i32) -> (i32, i32) {
    %c0_i32 = arith.constant 0 : i32
    %c0_i32_0 = arith.constant 0 : i32
    return %c0_i32, %arg0 : i32, i32
  }
  func.func @transform_1(%arg0: i32) -> (i32, i32, i32) {
    %c0_i32 = arith.constant 0 : i32
    %c0_i32_0 = arith.constant 0 : i32
    %c0_i32_1 = arith.constant 0 : i32
    %c0_i32_2 = arith.constant 0 : i32
    return %c0_i32, %c0_i32_0, %c0_i32_1 : i32, i32, i32
  }
  func.func @transform_2(%arg0: i32) -> (i32, i32, i32) {
    %c0_i32 = arith.constant 0 : i32
    %c0_i32_0 = arith.constant 0 : i32
    %c0_i32_1 = arith.constant 0 : i32
    %c0_i32_2 = arith.constant 0 : i32
    return %c0_i32, %c0_i32_0, %c0_i32_1 : i32, i32, i32
  }
  func.func @transform_3(%arg0: i32) -> (i32, i32) {
    %c0_i32 = arith.constant 0 : i32
    %c0_i32_0 = arith.constant 0 : i32
    %c0_i32_1 = arith.constant 0 : i32
    return %c0_i32, %c0_i32_0 : i32, i32
  }
  func.func @transform_4(%arg0: i32) -> (i32, i32) {
    %c0_i32 = arith.constant 0 : i32
    %c0_i32_0 = arith.constant 0 : i32
    %c0_i32_1 = arith.constant 0 : i32
    return %c0_i32, %c0_i32_0 : i32, i32
  }
  func.func @transform_5(%arg0: i32) -> (i32, i32) {
    %c0_i32 = arith.constant 0 : i32
    %c0_i32_0 = arith.constant 0 : i32
    %c0_i32_1 = arith.constant 0 : i32
    return %c0_i32, %c0_i32_0 : i32, i32
  }
  func.func @transform_6(%arg0: i32) -> (i32, i32) {
    %c0_i32 = arith.constant 0 : i32
    %c0_i32_0 = arith.constant 0 : i32
    %c0_i32_1 = arith.constant 0 : i32
    return %c0_i32, %c0_i32_0 : i32, i32
  }
  func.func @transform_7(%arg0: i32) -> (i32, i32) {
    %c0_i32 = arith.constant 0 : i32
    %c0_i32_0 = arith.constant 0 : i32
    return %c0_i32, %arg0 : i32, i32
  }
}

</mosaic_0001>

<bundles_post_ra>
// kernel: tpu_custom_call.1
= control target key start
LH: loop header
LB: loop body
LE: loop exit
PB: predicated region body
PF: predicated region fallthrough
CT: control target
= control target key end

     0   :  { %12 = vsyncpa [#allocation3], 0  ;;  %s1436_s0 = inlined_call_operand.vmem [shape: f32[4,256], index: 0, kind: input, shape index: {}]   ;;  %s1437_s1 = inlined_call_operand.vmem [shape: f32[5,4,4], index: 1, kind: input, shape index: {}]   ;;  %s1438_s2 = inlined_call_operand.vmem [shape: f32[5,4,4], index: 2, kind: input, shape index: {}]   ;;  %s1439_s3 = inlined_call_operand.vmem [shape: f32[4,128], index: 3, kind: input, shape index: {}]   ;;  %s1440_s4 = inlined_call_operand.vmem [shape: f32[4,128], index: 4, kind: input, shape index: {}]   ;;  %s1441_s5 = inlined_call_operand.vmem [shape: f32[4,128], index: 5, kind: input, shape index: {}]   ;;  %s1442_s6 = inlined_call_operand.vmem [shape: f32[4,128], index: 6, kind: input, shape index: {}]   ;;  %s1443_s7 = inlined_call_operand.hbm [shape: f32[4,256], index: 7, kind: output, shape index: {}]  }
   0x1   :  { %14 = vsyncpa [#allocation3 + $0x1], 0  ;;  %s1145_s24 = smov 0   ;;  %s1147_s25 = smov 0  }
   0x2   :  { %s1149_s26 = smov 0   ;;  %s1151_s27 = smov 0  }
   0x3 LB: > { %s1166_s28 = sadd.s32 4294967295, %s1093_s27   ;;  %s907_s29 = sadd.s32 4294967294, %s1093_s27   ;;  %s1093_s27 = sphi %s1151_s27, %s1449_s27   ;;  %s1089_s26 = sphi %s1149_s26, %s1448_s26   ;;  %s1085_s25 = sphi %s1147_s25, %s1447_s25   ;;  %s1081_s24 = sphi %s1145_s24, %s1446_s24  }
   0x4   : > { %s1170_s30 = sadd.s32 1, %s1093_s27   ;;  %s179_s8 = sadd.s32 1, %s1089_s26 }
   0x5   : > { %s176_s9 = ssub.s32 %s1093_s27, %s1170_s30  ;;  %p189_p0 = scmp.ne.s32.totalorder %s1089_s26, %s1085_s25 }
   0x6   : > { %p177_p1 = scmp.eq.s32.totalorder %s176_s9, 0  ;;  %p190_p2 = scmp.eq.s32.totalorder %s1166_s28, 1 }
   0x7   : > { %p195_p3 = scmp.ne.s32.totalorder %s1085_s25, %s1081_s24  ;;  %p196_p4 = scmp.eq.s32.totalorder %s907_s29, 1 }
   0x8   : > { %s1181_s10 = scalar_select %p177_p1, %s1089_s26, %s179_s8  }
   0x9   : > { %p1183_p5 = por %p190_p2, %p189_p0  ;;  %p1187_p6 = por %p196_p4, %p195_p3 }
   0xa   : > { %p910_p7 = scmp.ge.s32.totalorder %s1093_s27, 1  ;;  %p239_p8 = scmp.lt.s32.totalorder %s1093_s27, 3 }
   0xc   : > { %p240_p9 = pnand %p910_p7, %p239_p8 }
   0xd   : > { %v305_v0 = vld [vmem:[%s1437_s1] sm:$0xf] (!%p240_p9)  ;;  %v1095_v1 = vmov (!%p240_p9), 2   ;;  %v1096_v2 = vmov (!%p240_p9), 0   ;;  %p270_p10 = scmp.lt.s32.totalorder (!%p240_p9), %s1166_s28, 1  ;;  %v1097_v4 = vmov (!%p240_p9), 3   ;;  %v275_v10 = vlaneseq (!%p240_p9) }
   0xe   : > { %243 = sbr.rel (%p240_p9) target bundleno = 1399 (0x577), region = 48  ;;  %991 = vset.pattern.permute.xlu1 (!%p240_p9), %v1095_v1  ;;  %990 = vset.pattern.permute.xlu0 (!%p240_p9), %v1096_v2  ;;  %v918_v3 = vld [vmem:[%s1437_s1 + $0x4] sm:$0xf] (!%p240_p9)  ;;  %s1098_s22 = smov (!%p240_p9), 2   ;;  %v1099_v6 = vmov (!%p240_p9), 1   ;;  %v1103_v15 = vmov (!%p240_p9), 0.0  }
   0xf   : > { %327 = vperm.xlu1 (!%p240_p9), %991, %v305_v0   ;;  %308 = vperm.xlu0 (!%p240_p9), %990, %v305_v0   ;;  %v919_v7 = vld [vmem:[%s1437_s1 + $0x8] sm:$0xf] (!%p240_p9)  ;;  %s1100_s8 = smov (!%p240_p9), 1   ;;  %v920_v8 = vld [vmem:[%s1437_s1 + $0xc] sm:$0xf] (!%p240_p9)  ;;  %s1101_s16 = smov (!%p240_p9), 127  }
  0x10   : > { %v921_v9 = vld [vmem:[%s1437_s1 + $0x10] sm:$0xf] (!%p240_p9)  ;;  %v1243_v11 = vand.u32 (!%p240_p9), 127, %v275_v10  ;;  %v312_v14 = vshrl.u32 (!%p240_p9), %v275_v10, 7  ;;  %vm533_vm9 = vcmask (!%p240_p9), 1043456   ;;  %s927_s14 = sshll.u32 (!%p240_p9), %s1166_s28, 6 }
  0x12   : > { %vm278_vm0 = vcmp.ge.s32.totalorder (!%p240_p9), %v1243_v11, 2  ;;  %vm279_vm1 = vcmp.lt.s32.totalorder (!%p240_p9), %v1243_v11, 18  ;;  %v1250_v19 = vsub.s32 (!%p240_p9), 0, %v312_v14  ;;  %v1253_v21 = vsub.s32 (!%p240_p9), 1, %v312_v14 }
  0x13   : > { %353 = vperm.xlu0 (!%p240_p9), %990, %v918_v3   ;;  %992 = vset.pattern.permute.xlu1 (!%p240_p9), %v1097_v4  ;;  %vm280_vm2 = vmand (!%p240_p9), %vm278_vm0, %vm279_vm1  ;;  %v1255_v23 = vsub.s32 (!%p240_p9), 2, %v312_v14  ;;  %vm283_vm3 = vcmp.ge.s32.totalorder (!%p240_p9), %v1243_v11, 1  ;;  %vm284_vm4 = vcmp.lt.s32.totalorder (!%p240_p9), %v1243_v11, 17  ;;  %v1261_v27 = vsub.s32 (!%p240_p9), 3, %v312_v14 }
  0x14   : > { %v1248_v16 = vsel (!%p240_p9), %vm280_vm2, 1.0, %v1103_v15  ;;  %vm285_vm5 = vmand (!%p240_p9), %vm283_vm3, %vm284_vm4  ;;  %vm277_vm6 = vcmp.lt.s32.totalorder (!%p240_p9), %v1243_v11, 16  ;;  %vm293_vm7 = vcmp.lt.s32.totalorder (!%p240_p9), %v1243_v11, 15  ;;  %vm298_vm8 = vcmp.lt.s32.totalorder (!%p240_p9), %v1243_v11, 14 }
  0x15   : > { %s271_s17 = scalar_select %p270_p10, %s1166_s28, 1  ;;  %v1265_v34 = vsel %vm285_vm5, 1.0, %v1103_v15  ;;  %v1276_v49 = vsel %vm277_vm6, 1.0, %v1103_v15 }
  0x16   : > { %s1104_s28 = smov [#allocation2]  }
  0x17   : > { %s912_s18 = sshll.u32 %s271_s17, 2  ;;  %994 = vset.pattern.permute.xlu0 %v1095_v1  ;;  %s1102_s17 = smov 126  }
  0x18   : > { %s273_s21 = scalar_lea.vmem %s1436_s0, %s912_s18  ;;  %373 = vperm.xlu0 %994, %v918_v3  }
  0x19   : > { %v1207_v5 = vld [vmem:[%s273_s21] sm:$0xf] }
  0x1a   : > { %302 = vrot.lane.b32.xlu1 %v1207_v5, %s1098_s22  ;;  %v392_v54 = vmul.f32 %v1276_v49, %v1207_v5 }
  0x1c   : > { %995 = vset.pattern.permute.xlu0 %v1099_v6  ;;  %v403_v58 = vrot.slane %v392_v54, %v1250_v19  ;;  %v413_v60 = vrot.slane %v392_v54, %v1253_v21  ;;  %v433_v10 = vrot.slane %v392_v54, %v1261_v27 }
  0x1d   : > { %317 = vperm.xlu0 %995, %v305_v0  }
  0x1e   : > { %337 = vperm.xlu1 %992, %v305_v0  }
  0x21   : > { %407 = vperm.xlu0 %995, %v919_v7  }
  0x22   : > { %993 = vset.pattern.permute.xlu1 %v1099_v6 }
  0x23   : > { %363 = vperm.xlu1 %993, %v918_v3  }
  0x25   : > { %1000 = vset.pattern.permute.xlu0 %v1096_v2 }
  0x26   : > { %443 = vperm.xlu0 %1000, %v920_v8  }
  0x27   : > { %346 = vrot.lane.b32.xlu1 %v1207_v5, %s1100_s8 }
  0x28   : > { %996 = vset.pattern.permute.xlu1 %v1097_v4 }
  0x2a   : > { %1002 = vset.pattern.permute.xlu0 %v1095_v1 }
  0x2b   : > { %383 = vperm.xlu1 %996, %v918_v3   ;;  %463 = vperm.xlu0 %1002, %v920_v8  }
  0x2f   : > { %997 = vset.pattern.permute.xlu1 %v1096_v2  ;;  %1005 = vset.pattern.permute.xlu0 %v1099_v6 }
  0x30   : > { %397 = vperm.xlu1 %997, %v919_v7   ;;  %499 = vperm.xlu0 %1005, %v921_v9  }
  0x34   : > { %998 = vset.pattern.permute.xlu1 %v1095_v1  ;;  %1007 = vset.pattern.permute.xlu0 %v1097_v4 }
  0x35   : > { %417 = vperm.xlu1 %998, %v919_v7   ;;  %519 = vperm.xlu0 %1007, %v921_v9  }
  0x39   : > { %999 = vset.pattern.permute.xlu1 %v1097_v4  ;;  %1009 = vset.pattern.permute.xlu0 %v1099_v6 }
  0x3a   : > { %427 = vperm.xlu1 %999, %v919_v7   ;;  %v423_v7 = vrot.slane %v392_v54, %v1255_v23 }
  0x3e   : > { %1001 = vset.pattern.permute.xlu1 %v1099_v6 }
  0x3f   : > { %453 = vperm.xlu1 %1001, %v920_v8  }
  0x43   : > { %436 = vrot.lane.b32.xlu1 %v1207_v5, %s1101_s16 }
  0x44   : > { %1003 = vset.pattern.permute.xlu1 %v1097_v4 }
  0x47   : > { %473 = vperm.xlu1 %1003, %v920_v8  }
  0x4b   : > { %1004 = vset.pattern.permute.xlu1 %v1096_v2 }
  0x4c   : > { %489 = vperm.xlu1 %1004, %v921_v9  }
  0x50   : > { %482 = vrot.lane.b32.xlu1 %v1207_v5, %s1102_s17 }
  0x51   : > { %1006 = vset.pattern.permute.xlu1 %v1095_v1 }
  0x54   : > { %509 = vperm.xlu1 %1006, %v921_v9  }
  0x58   : > { %1008 = vset.pattern.permute.xlu1 %v1096_v2 }
  0x8e   : > { %v328_v12 = vpop.permute.xlu1 %327  ;;  %v309_v13 = vpop.permute.xlu0 %308 }
  0x92   : > { %v303_v17 = vpop.permute.xlu1 %302  ;;  %v354_v18 = vpop.permute.xlu0 %353 }
  0x93   : > { %v304_v20 = vmul.f32 %v1248_v16, %v303_v17 }
  0x95   : > { %v314_v25 = vrot.slane %v304_v20, %v1250_v19  ;;  %v323_v26 = vrot.slane %v304_v20, %v1253_v21  ;;  %v333_v29 = vrot.slane %v304_v20, %v1255_v23  ;;  %v343_v35 = vrot.slane %v304_v20, %v1261_v27 }
  0x97   : > { %v374_v22 = vpop.permute.xlu0 %373  ;;  %v315_v30 = vmul.f32 %v314_v25, %v309_v13  ;;  %v334_v36 = vmul.f32 %v333_v29, %v328_v12  ;;  %v1287_v12 = vsel %vm293_vm7, 1.0, %v1103_v15 }
  0x9c   : > { %v318_v28 = vpop.permute.xlu0 %317 }
  0x9d   : > { %v338_v24 = vpop.permute.xlu1 %337  ;;  %v324_v31 = vmul.f32 %v323_v26, %v318_v28 }
  0x9e   : > { %v344_v40 = vmul.f32 %v343_v35, %v338_v24 }
  0x9f   : > { %v325_v33 = vadd.f32 %v324_v31, %v315_v30 }
  0xa0   : > { %v408_v61 = vpop.permute.xlu0 %407 }
  0xa1   : > { %v335_v38 = vadd.f32 %v334_v36, %v325_v33  ;;  %v414_v3 = vmul.f32 %v413_v60, %v408_v61 }
  0xa2   : > { %v364_v32 = vpop.permute.xlu1 %363 }
  0xa3   : > { %v345_v44 = vadd.f32 %v344_v40, %v335_v38 }
  0xa6   : > { %v347_v37 = vpop.permute.xlu1 %346 }
  0xa7   : > { %v348_v39 = vmul.f32 %v1265_v34, %v347_v37  ;;  %v1295_v37 = vsel %vm298_vm8, 1.0, %v1103_v15 }
  0xa9   : > { %v359_v41 = vrot.slane %v348_v39, %v1250_v19  ;;  %v369_v42 = vrot.slane %v348_v39, %v1253_v21  ;;  %v379_v48 = vrot.slane %v348_v39, %v1255_v23  ;;  %v389_v53 = vrot.slane %v348_v39, %v1261_v27 }
  0xaa   : > { %v384_v43 = vpop.permute.xlu1 %383 }
  0xab   : > { %v360_v45 = vmul.f32 %v359_v41, %v354_v18  ;;  %v370_v47 = vmul.f32 %v369_v42, %v364_v32  ;;  %v380_v52 = vmul.f32 %v379_v48, %v374_v22  ;;  %v390_v57 = vmul.f32 %v389_v53, %v384_v43  ;;  %v444_v22 = vpop.permute.xlu0 %443 }
  0xad   : > { %v361_v46 = vadd.f32 %v360_v45, %v345_v44 }
  0xaf   : > { %v371_v50 = vadd.f32 %v370_v47, %v361_v46  ;;  %v398_v51 = vpop.permute.xlu1 %397  ;;  %v464_v33 = vpop.permute.xlu0 %463 }
  0xb0   : > { %v404_v62 = vmul.f32 %v403_v58, %v398_v51 }
  0xb1   : > { %v381_v55 = vadd.f32 %v380_v52, %v371_v50 }
  0xb3   : > { %v391_v59 = vadd.f32 %v390_v57, %v381_v55  ;;  %v500_v43 = vpop.permute.xlu0 %499 }
  0xb4   : > { %v418_v56 = vpop.permute.xlu1 %417 }
  0xb5   : > { %v405_v0 = vadd.f32 %v404_v62, %v391_v59  ;;  %v424_v13 = vmul.f32 %v423_v7, %v418_v56  ;;  %v572_v62 = vld [vmem:[%s1438_s2] sm:$0xf] }
  0xb7   : > { %v415_v9 = vadd.f32 %v414_v3, %v405_v0  ;;  %v520_v54 = vpop.permute.xlu0 %519 }
  0xb9   : > { %v428_v63 = vpop.permute.xlu1 %427  ;;  %v425_v17 = vadd.f32 %v424_v13, %v415_v9 }
  0xba   : > { %v434_v18 = vmul.f32 %v433_v10, %v428_v63  ;;  %v922_v63 = vld [vmem:[%s1438_s2 + $0x4] sm:$0xf] }
  0xbc   : > { %v435_v28 = vadd.f32 %v434_v18, %v425_v17 }
  0xbe   : > { %v454_v8 = vpop.permute.xlu1 %453 }
  0xc2   : > { %v437_v14 = vpop.permute.xlu1 %436 }
  0xc3   : > { %v438_v20 = vmul.f32 %v1287_v12, %v437_v14 }
  0xc5   : > { %v449_v24 = vrot.slane %v438_v20, %v1250_v19  ;;  %v459_v25 = vrot.slane %v438_v20, %v1253_v21  ;;  %v469_v32 = vrot.slane %v438_v20, %v1255_v23  ;;  %v479_v39 = vrot.slane %v438_v20, %v1261_v27 }
  0xc6   : > { %v474_v26 = vpop.permute.xlu1 %473 }
  0xc7   : > { %v450_v29 = vmul.f32 %v449_v24, %v444_v22  ;;  %v460_v31 = vmul.f32 %v459_v25, %v454_v8  ;;  %v470_v38 = vmul.f32 %v469_v32, %v464_v33  ;;  %v480_v44 = vmul.f32 %v479_v39, %v474_v26  ;;  %v923_v24 = vld [vmem:[%s1438_s2 + $0x8] sm:$0xf]  ;;  %v924_v25 = vld [vmem:[%s1438_s2 + $0xc] sm:$0xf] }
  0xc9   : > { %v451_v30 = vadd.f32 %v450_v29, %v435_v28 }
  0xcb   : > { %v490_v35 = vpop.permute.xlu1 %489  ;;  %v461_v36 = vadd.f32 %v460_v31, %v451_v30 }
  0xcd   : > { %v471_v41 = vadd.f32 %v470_v38, %v461_v36  ;;  %v528_v38 = vld [vmem:[%s1439_s3] sm:$0xf] }
  0xcf   : > { %v483_v40 = vpop.permute.xlu1 %482  ;;  %v481_v47 = vadd.f32 %v480_v44, %v471_v41  ;;  %v529_v41 = vld [vmem:[%s1440_s4] sm:$0xf] }
  0xd0   : > { %v484_v42 = vmul.f32 %v1295_v37, %v483_v40 }
  0xd2   : > { %v495_v45 = vrot.slane %v484_v42, %v1250_v19  ;;  %v505_v46 = vrot.slane %v484_v42, %v1253_v21  ;;  %v515_v50 = vrot.slane %v484_v42, %v1255_v23  ;;  %v525_v15 = vrot.slane %v484_v42, %v1261_v27 }
  0xd3   : > { %v510_v51 = vpop.permute.xlu1 %509 }
  0xd4   : > { %v496_v48 = vmul.f32 %v495_v45, %v490_v35  ;;  %v506_v52 = vmul.f32 %v505_v46, %v500_v43  ;;  %v516_v56 = vmul.f32 %v515_v50, %v510_v51  ;;  %v526_v57 = vmul.f32 %v525_v15, %v520_v54  ;;  %v925_v45 = vld [vmem:[%s1438_s2 + $0x10] sm:$0xf] }
  0xd6   : > { %v497_v53 = vadd.f32 %v496_v48, %v481_v47 }
  0xd8   : > { %v507_v55 = vadd.f32 %v506_v52, %v497_v53 }
  0xda   : > { %v517_v58 = vadd.f32 %v516_v56, %v507_v55 }
  0xdc   : > { %v527_v59 = vadd.f32 %v526_v57, %v517_v58 }
  0xde   : > { %v532_v60 = vsel %vm277_vm6, %v527_v59, 0.0 }
  0xdf   : > { %v534_v61 = vsel %vm533_vm9, %v532_v60, 0.0 }
  0xe0   : > { %535 = vadd.xlane.f32.xlu1 %v534_v61 }
  0xf1   : > { %575 = vperm.xlu1 %1008, %v572_v62  }
  0xf5   : > { %1010 = vset.pattern.permute.xlu1 %v1095_v1 }
  0xf6   : > { %594 = vperm.xlu1 %1010, %v572_v62  }
  0xfa   : > { %1011 = vset.pattern.permute.xlu1 %v1097_v4 }
  0xfb   : > { %604 = vperm.xlu1 %1011, %v572_v62  }
  0xff   : > { %1012 = vset.pattern.permute.xlu1 %v1096_v2 }
 0x100   : > { %620 = vperm.xlu1 %1012, %v922_v63  }
 0x104   : > { %1013 = vset.pattern.permute.xlu1 %v1099_v6 }
 0x105   : > { %630 = vperm.xlu1 %1013, %v922_v63  }
 0x109   : > { %1014 = vset.pattern.permute.xlu1 %v1095_v1 }
 0x10a   : > { %640 = vperm.xlu1 %1014, %v922_v63  }
 0x10e   : > { %1015 = vset.pattern.permute.xlu1 %v1097_v4 }
 0x10f   : > { %650 = vperm.xlu1 %1015, %v922_v63  }
 0x113   : > { %1017 = vset.pattern.permute.xlu1 %v1099_v6 }
 0x114   : > { %674 = vperm.xlu1 %1017, %v923_v24  }
 0x118   : > { %1018 = vset.pattern.permute.xlu1 %v1095_v1 }
 0x16d   : > { %v536_v0 = vpop.xlane.xlu1 %535 }
 0x16e   : > { %v537_v3 = vrot.slane %v536_v0, 4 }
 0x170   : > { %v538_v7 = vadd.f32 %v537_v3, %v536_v0 }
 0x171   : > { %v576_v46 = vpop.permute.xlu1 %575 }
 0x172   : > { %v539_v8 = vrot.slane %v538_v7, 2 }
 0x174   : > { %v540_v9 = vadd.f32 %v539_v8, %v538_v7 }
 0x176   : > { %v541_v10 = vrot.slane %v540_v9, 1 }
 0x178   : > { %v542_v13 = vadd.f32 %v541_v10, %v540_v9 }
 0x17a   : > { %930 = vpush %v542_v13 }
 0x1ab   : > { %s931_s23 = spop %930 }
 0x1ac   : > { %s544_s29 = smul.f32 0.015625, %s931_s23 }
 0x1ae   : > { %v545_v14 = vstv %s544_s29 }
 0x1af   : > { %v546_v17 = vsub.f32 %v527_v59, %v545_v14 }
 0x1b1   : > { %v547_v18 = vsel %vm277_vm6, %v546_v17, 0.0 }
 0x1b2   : > { %v548_v20 = vmul.f32 %v547_v18, %v547_v18 }
 0x1b4   : > { %v549_v22 = vsel %vm533_vm9, %v548_v20, 0.0 }
 0x1b5   : > { %550 = vadd.xlane.f32.xlu0 %v549_v22 }
 0x1cb   : > { %584 = vperm.xlu0 %1009, %v572_v62  }
 0x1cf   : > { %1016 = vset.pattern.permute.xlu0 %v1096_v2 }
 0x1d0   : > { %664 = vperm.xlu0 %1016, %v923_v24  }
 0x1d4   : > { %1019 = vset.pattern.permute.xlu0 %v1097_v4 }
 0x1d5   : > { %694 = vperm.xlu0 %1019, %v923_v24  }
 0x1d9   : > { %740 = vperm.xlu0 %1019, %v924_v25  }
 0x1dd   : > { %1024 = vset.pattern.permute.xlu0 %v1099_v6 }
 0x242   : > { %v551_v26 = vpop.xlane.xlu0 %550 }
 0x243   : > { %v552_v28 = vrot.slane %v551_v26, 4 }
 0x245   : > { %v553_v29 = vadd.f32 %v552_v28, %v551_v26 }
 0x247   : > { %v554_v30 = vrot.slane %v553_v29, 2 }
 0x249   : > { %v555_v31 = vadd.f32 %v554_v30, %v553_v29 }
 0x24a   : > { %v585_v56 = vpop.permute.xlu0 %584 }
 0x24b   : > { %v556_v32 = vrot.slane %v555_v31, 1 }
 0x24d   : > { %v557_v33 = vadd.f32 %v556_v32, %v555_v31 }
 0x24f   : > { %932 = vpush %v557_v33  ;;  %v665_v10 = vpop.permute.xlu0 %664 }
 0x280   : > { %s933_s18 = spop %932 }
 0x281   : > { %s559_s19 = smul.f32 0.015625, %s933_s18 }
 0x283   : > { %s560_s20 = sadd.f32 1e-05, %s559_s19  ;;  %s267_s19 = sand.u32 1, %s1085_s25  }
 0x285   : > { %v561_v35 = vstv %s560_s20  ;;  %s911_s20 = sshll.u32 %s267_s19, 2 }
 0x286   : > { %1027 = vrsqrt.f32 %v561_v35  ;;  %s269_s15 = scalar_lea.vmem [#allocation2], %s911_s20  ;;  %s1035_s20 = sshll.u32 %s1104_s28, 4  ;;  %s1036_s20 = int_to_ptr.vmem [resolvable:$false] %s1035_s20 }
 0x287   : > { %s1037_s23 = scalar_lea.vmem %s1036_s20, 128 }
 0x290   : > { %v1028_v36 = vpop.eup %1027 }
 0x291   : > { %934 = vpush %v1028_v36 }
 0x2c2   : > { %s935_s21 = spop %934 }
 0x2c3   : > { %v564_v39 = vstv %s935_s21 }
 0x2c4   : > { %v565_v40 = vmul.f32 %v564_v39, %v546_v17 }
 0x2c6   : > { %v566_v42 = vmul.f32 %v565_v40, %v528_v38 }
 0x2c8   : > { %v567_v43 = vadd.f32 %v566_v42, %v529_v41 }
 0x2ca   : > { %v568_v44 = vmax.f32 %v567_v43, 0.0 }
 0x2cc   : > { %703 = vrot.lane.b32.xlu0 %v568_v44, %s1101_s16  ;;  %569 = vrot.lane.b32.xlu1 %v568_v44, %s1098_s22  ;;  %v659_v18 = vmul.f32 %v1276_v49, %v568_v44 }
 0x2ce   : > { %v680_v32 = vrot.slane %v659_v18, %v1253_v21  ;;  %v690_v38 = vrot.slane %v659_v18, %v1255_v23  ;;  %v700_v42 = vrot.slane %v659_v18, %v1261_v27 }
 0x2d0   : > { %613 = vrot.lane.b32.xlu1 %v568_v44, %s1100_s8  ;;  %766 = vperm.xlu0 %1024, %v925_v45  }
 0x2d4   : > { %684 = vperm.xlu1 %1018, %v923_v24   ;;  %1026 = vset.pattern.permute.xlu0 %v1097_v4  ;;  %v595_v4 = vpop.permute.xlu1 %594  ;;  %v695_v24 = vpop.permute.xlu0 %694 }
 0x2d5   : > { %786 = vperm.xlu0 %1026, %v925_v45  }
 0x2d8   : > { %1020 = vset.pattern.permute.xlu1 %v1096_v2  ;;  %v605_v47 = vpop.permute.xlu1 %604  ;;  %v741_v30 = vpop.permute.xlu0 %740 }
 0x2d9   : > { %710 = vperm.xlu1 %1020, %v924_v25  }
 0x2dc   : > { %v621_v48 = vpop.permute.xlu1 %620 }
 0x2dd   : > { %1021 = vset.pattern.permute.xlu1 %v1099_v6 }
 0x2de   : > { %720 = vperm.xlu1 %1021, %v924_v25  }
 0x2e0   : > { %v631_v50 = vpop.permute.xlu1 %630 }
 0x2e2   : > { %1022 = vset.pattern.permute.xlu1 %v1095_v1 }
 0x2e3   : > { %730 = vperm.xlu1 %1022, %v924_v25   ;;  %v670_v25 = vrot.slane %v659_v18, %v1250_v19 }
 0x2e4   : > { %v641_v51 = vpop.permute.xlu1 %640 }
 0x2e5   : > { %v671_v31 = vmul.f32 %v670_v25, %v665_v10 }
 0x2e7   : > { %1023 = vset.pattern.permute.xlu1 %v1096_v2 }
 0x2e8   : > { %756 = vperm.xlu1 %1023, %v925_v45   ;;  %v651_v15 = vpop.permute.xlu1 %650 }
 0x2ec   : > { %749 = vrot.lane.b32.xlu1 %v568_v44, %s1102_s17  ;;  %v675_v6 = vpop.permute.xlu1 %674 }
 0x2ed   : > { %1025 = vset.pattern.permute.xlu1 %v1095_v1  ;;  %v681_v36 = vmul.f32 %v680_v32, %v675_v6 }
 0x2f0   : > { %776 = vperm.xlu1 %1025, %v925_v45   ;;  %v701_v45 = vmul.f32 %v700_v42, %v695_v24 }
 0x33e   : > { %v570_v52 = vpop.permute.xlu1 %569  ;;  %v704_v49 = vpop.permute.xlu0 %703 }
 0x33f   : > { %v571_v53 = vmul.f32 %v1248_v16, %v570_v52  ;;  %v705_v43 = vmul.f32 %v1287_v12, %v704_v49  ;;  %v796_v49 = vld [vmem:[%s1441_s5] sm:$0xf] }
 0x341   : > { %v581_v54 = vrot.slane %v571_v53, %v1250_v19  ;;  %v590_v2 = vrot.slane %v571_v53, %v1253_v21  ;;  %v600_v55 = vrot.slane %v571_v53, %v1255_v23  ;;  %v610_v59 = vrot.slane %v571_v53, %v1261_v27 }
 0x342   : > { %v614_v1 = vpop.permute.xlu1 %613 }
 0x343   : > { %v582_v57 = vmul.f32 %v581_v54, %v576_v46  ;;  %v591_v58 = vmul.f32 %v590_v2, %v585_v56  ;;  %v615_v60 = vmul.f32 %v1265_v34, %v614_v1  ;;  %v601_v62 = vmul.f32 %v600_v55, %v595_v4 }
 0x344   : > { %v611_v16 = vmul.f32 %v610_v59, %v605_v47  ;;  %v716_v46 = vrot.slane %v705_v43, %v1250_v19  ;;  %v746_v2 = vrot.slane %v705_v43, %v1261_v27 }
 0x345   : > { %v592_v61 = vadd.f32 %v591_v58, %v582_v57  ;;  %v626_v63 = vrot.slane %v615_v60, %v1250_v19  ;;  %v636_v3 = vrot.slane %v615_v60, %v1253_v21  ;;  %v646_v9 = vrot.slane %v615_v60, %v1255_v23 }
 0x346   : > { %v656_v34 = vrot.slane %v615_v60, %v1261_v27  ;;  %v747_v57 = vmul.f32 %v746_v2, %v741_v30 }
 0x347   : > { %v602_v0 = vadd.f32 %v601_v62, %v592_v61  ;;  %v627_v8 = vmul.f32 %v626_v63, %v621_v48  ;;  %v637_v14 = vmul.f32 %v636_v3, %v631_v50  ;;  %v647_v20 = vmul.f32 %v646_v9, %v641_v51 }
 0x348   : > { %v657_v26 = vmul.f32 %v656_v34, %v651_v15  ;;  %v726_v50 = vrot.slane %v705_v43, %v1253_v21  ;;  %v736_v15 = vrot.slane %v705_v43, %v1255_v23 }
 0x349   : > { %v612_v7 = vadd.f32 %v611_v16, %v602_v0 }
 0x34b   : > { %v628_v13 = vadd.f32 %v627_v8, %v612_v7 }
 0x34d   : > { %v638_v17 = vadd.f32 %v637_v14, %v628_v13 }
 0x34f   : > { %v648_v22 = vadd.f32 %v647_v20, %v638_v17  ;;  %v767_v1 = vpop.permute.xlu0 %766 }
 0x351   : > { %v658_v29 = vadd.f32 %v657_v26, %v648_v22 }
 0x353   : > { %v685_v28 = vpop.permute.xlu1 %684  ;;  %v672_v33 = vadd.f32 %v671_v31, %v658_v29 }
 0x354   : > { %v691_v40 = vmul.f32 %v690_v38, %v685_v28  ;;  %v787_v7 = vpop.permute.xlu0 %786 }
 0x355   : > { %v682_v39 = vadd.f32 %v681_v36, %v672_v33 }
 0x357   : > { %v692_v44 = vadd.f32 %v691_v40, %v682_v39 }
 0x358   : > { %v711_v35 = vpop.permute.xlu1 %710 }
 0x359   : > { %v702_v47 = vadd.f32 %v701_v45, %v692_v44  ;;  %v717_v48 = vmul.f32 %v716_v46, %v711_v35 }
 0x35b   : > { %v718_v52 = vadd.f32 %v717_v48, %v702_v47 }
 0x35d   : > { %v721_v41 = vpop.permute.xlu1 %720 }
 0x35e   : > { %v727_v51 = vmul.f32 %v726_v50, %v721_v41  ;;  %v797_v41 = vld [vmem:[%s1442_s6] sm:$0xf] }
 0x360   : > { %v728_v54 = vadd.f32 %v727_v51, %v718_v52 }
 0x362   : > { %v731_v4 = vpop.permute.xlu1 %730 }
 0x363   : > { %v737_v53 = vmul.f32 %v736_v15, %v731_v4 }
 0x365   : > { %v738_v12 = vadd.f32 %v737_v53, %v728_v54 }
 0x367   : > { %v757_v6 = vpop.permute.xlu1 %756  ;;  %v748_v60 = vadd.f32 %v747_v57, %v738_v12 }
 0x36b   : > { %v750_v55 = vpop.permute.xlu1 %749 }
 0x36c   : > { %v751_v56 = vmul.f32 %v1295_v37, %v750_v55 }
 0x36e   : > { %v762_v58 = vrot.slane %v751_v56, %v1250_v19  ;;  %v772_v59 = vrot.slane %v751_v56, %v1253_v21  ;;  %v782_v62 = vrot.slane %v751_v56, %v1255_v23  ;;  %v792_v0 = vrot.slane %v751_v56, %v1261_v27 }
 0x36f   : > { %v777_v63 = vpop.permute.xlu1 %776 }
 0x370   : > { %v763_v61 = vmul.f32 %v762_v58, %v757_v6  ;;  %v773_v3 = vmul.f32 %v772_v59, %v767_v1  ;;  %v783_v9 = vmul.f32 %v782_v62, %v777_v63  ;;  %v793_v10 = vmul.f32 %v792_v0, %v787_v7 }
 0x372   : > { %v764_v16 = vadd.f32 %v763_v61, %v748_v60 }
 0x374   : > { %v774_v8 = vadd.f32 %v773_v3, %v764_v16 }
 0x376   : > { %v784_v37 = vadd.f32 %v783_v9, %v774_v8 }
 0x378   : > { %v794_v13 = vadd.f32 %v793_v10, %v784_v37 }
 0x37a   : > { %v795_v14 = vadd.f32 %v794_v13, %v1207_v5 }
 0x37c   : > { %v798_v19 = vsel %vm277_vm6, %v795_v14, 0.0 }
 0x37d   : > { %v799_v21 = vsel %vm533_vm9, %v798_v19, 0.0 }
 0x37e   : > { %800 = vadd.xlane.f32.xlu1 %v799_v21 }
 0x40b   : > { %v801_v23 = vpop.xlane.xlu1 %800 }
 0x40c   : > { %v802_v17 = vrot.slane %v801_v23, 4 }
 0x40e   : > { %v803_v18 = vadd.f32 %v802_v17, %v801_v23 }
 0x410   : > { %v804_v27 = vrot.slane %v803_v18, 2 }
 0x412   : > { %v805_v20 = vadd.f32 %v804_v27, %v803_v18 }
 0x414   : > { %v806_v34 = vrot.slane %v805_v20, 1 }
 0x416   : > { %v807_v22 = vadd.f32 %v806_v34, %v805_v20 }
 0x418   : > { %936 = vpush %v807_v22 }
 0x449   : > { %s937_s22 = spop %936 }
 0x44a   : > { %s809_s8 = smul.f32 0.015625, %s937_s22  ;;  %s848_s22 = sshll.u32 %s269_s15, 4  ;;  %s1396_s22 = int_to_ptr.vmem [resolvable:$true] %s848_s22 }
 0x44b   : > { %p1038_p0 = scmp.lt.s32.totalorder %s1396_s22, %s1036_s20 }
 0x44c   : > { %v810_v24 = vstv %s809_s8 }
 0x44d   : > { %v811_v25 = vsub.f32 %v795_v14, %v810_v24 }
 0x44f   : > { %v812_v5 = vsel %vm277_vm6, %v811_v25, 0.0 }
 0x450   : > { %v813_v26 = vmul.f32 %v812_v5, %v812_v5 }
 0x452   : > { %v814_v28 = vsel %vm533_vm9, %v813_v26, 0.0 }
 0x453   : > { %815 = vadd.xlane.f32.xlu0 %v814_v28 }
 0x4e0   : > { %v816_v29 = vpop.xlane.xlu0 %815 }
 0x4e1   : > { %v817_v30 = vrot.slane %v816_v29, 4 }
 0x4e3   : > { %v818_v31 = vadd.f32 %v817_v30, %v816_v29 }
 0x4e5   : > { %v819_v32 = vrot.slane %v818_v31, 2 }
 0x4e7   : > { %v820_v33 = vadd.f32 %v819_v32, %v818_v31 }
 0x4e9   : > { %v821_v35 = vrot.slane %v820_v33, 1 }
 0x4eb   : > { %v822_v36 = vadd.f32 %v821_v35, %v820_v33 }
 0x4ed   : > { %938 = vpush %v822_v36 }
 0x51e   : > { %s939_s16 = spop %938 }
 0x51f   : > { %s824_s17 = smul.f32 0.015625, %s939_s16 }
 0x521   : > { %s825_s18 = sadd.f32 1e-05, %s824_s17  ;;  %s1394_s17 = scalar_lea.hbm %s1443_s7, %s927_s14 }
 0x523   : > { %v826_v38 = vstv %s825_s18  ;;  %s835_s18 = scalar_lea.sflag [#allocation3], %s267_s19 }
 0x524   : > { %1029 = vrsqrt.f32 %v826_v38 }
 0x52e   : > { %v1030_v11 = vpop.eup %1029 }
 0x52f   : > { %940 = vpush %v1030_v11 }
 0x560   : > { %s941_s21 = spop %940 }
 0x561   : > { %v829_v39 = vstv %s941_s21  ;;  %s1031_s21 = scalar_lea.vmem %s1396_s22, 64 }
 0x562   : > { %v830_v40 = vmul.f32 %v829_v39, %v811_v25  ;;  %p1032_p11 = scmp.ne.s32.totalorder %s1396_s22, %s1031_s21  ;;  %p1039_p1 = scmp.lt.s32.totalorder %s1037_s23, %s1031_s21 }
 0x564   : > { %v831_v42 = vmul.f32 %v830_v40, %v796_v49  ;;  %p1033_p12 = pnand %p1032_p11, %p1183_p5  ;;  %p1040_p2 = por %p1039_p1, %p1038_p0 }
 0x566   : > { %v832_v43 = vadd.f32 %v831_v42, %v797_v41  ;;  %p1034_p13 = pneg %p1033_p12 }
 0x568   : > { %833 = vst [vmem:[%s269_s15] sm:$0xf] %v832_v43  ;;  %p1041_p3 = pnand %p1040_p2, %p1034_p13 }
 0x56a   : > { %1044 = shalt.err (!%p1041_p3)
}
 0x56b   : > { %s1045_s19 = scalar_lea.hbm %s1394_s17, 64  ;;  %s1049_s13 = scalar_lea.hbm %s1443_s7, 128 }
 0x56c   : > { %p1046_p4 = scmp.ne.s32.totalorder %s1394_s17, %s1045_s19  ;;  %p1050_p9 = scmp.lt.u32.totalorder %s1394_s17, %s1443_s7 }
 0x56d   : > { %p1051_p10 = scmp.lt.u32.totalorder %s1049_s13, %s1045_s19  ;;  %p1053_p12 = scmp.lt.u32.totalorder %s1045_s19, %s1394_s17 }
 0x56e   : > { %p1047_p7 = pnand %p1046_p4, %p1183_p5 }
 0x56f   : > { %p1052_p11 = por %p1051_p10, %p1050_p9 }
 0x570   : > { %p1048_p8 = pneg %p1047_p7 }
 0x571   : > { %p1054_p13 = por %p1053_p12, %p1052_p11 }
 0x573   : > { %p1055_p0 = pnand %p1054_p13, %p1048_p8 }
 0x575   : > { %1058 = shalt.err (!%p1055_p0)
}
 0x576   : > { %942 = dma.vmem_to_hbm [thread:$0]  (%p1183_p5), %s1396_s22, 64, %s1394_s17, %s835_s18  }
 0x577 PF: > { %p948_p1 = scmp.ge.s32.totalorder %s1093_s27, 2  ;;  %s860_s8 = sand.u32 1, %s1081_s24  }
 0x578   : > { %s861_s16 = scalar_lea.sflag [#allocation3], %s860_s8 }
 0x579   : > { %p945_p2 = pnand %p948_p1, %p1187_p6 }
 0x57b   : > { %1076 = dma.done.wait (!%p945_p2), %s861_s16, 64  }
 0x57c   : > { %1078 = vsyncadd (!%p945_p2), %s861_s16, 4294967232  ;;  %p17_p3 = scmp.ge.s32.totalorder %s1170_s30, 4   ;;  %s1446_s24 = smov %s1085_s25 }
 0x57d   : > { %s1447_s25 = smov %s1089_s26  ;;  %s1448_s26 = smov %s1181_s10 }
 0x57e   : > { %s1449_s27 = smov %s1170_s30  ;;  %19 = sbr.rel (!%p17_p3) target bundleno = 3 (0x3), region = 91 }
 0x585   :  { %866 = vsyncpa [#allocation3], 1 }
 0x586   :  { %868 = vsyncpa [#allocation3 + $0x1], 1 }

</bundles_post_ra>
